<compile_context>
chip_gen: v5e
topology: v5e:2x2
jax: 0.10.0
libtpu: 0.0.40
codegen_flags: <defaults>
</compile_context>

<pallas_src>
import math
import functools

import jax
import jax.numpy as jnp
from jax.experimental import pallas as pl
from jax.experimental.pallas import tpu as pltpu

LRELU_SLOPE = 0.2
SQRT2_INV = 1.0 / math.sqrt(2.0)


# ----------------------------- Pallas kernels ------------------------------

def _mm_kernel(a_ref, w_ref, b_ref, o_ref, acc_ref, *, slope):
    """out = act(A @ W + b), K-tiled accumulation in f32 scratch."""
    k = pl.program_id(2)

    @pl.when(k == 0)
    def _init():
        acc_ref[...] = jnp.zeros_like(acc_ref)

    acc_ref[...] += jnp.dot(a_ref[...], w_ref[...],
                            preferred_element_type=jnp.float32)

    @pl.when(k == pl.num_programs(2) - 1)
    def _epilogue():
        acc = acc_ref[...] + b_ref[...]          # (tm,tn) + (1,tn)
        if slope is not None:
            acc = jnp.maximum(acc, acc * slope)  # LeakyReLU
        o_ref[...] = acc.astype(o_ref.dtype)


def _mm_proj_kernel(a_ref, w_ref, b_ref, xs_ref, wp_ref, bp_ref,
                    o_ref, acc_ref, *, slope, res_scale):
    """out = (act(A @ W + b) + (Xs @ Wp + bp)) * res_scale  (fused proj residual)."""
    k = pl.program_id(2)

    @pl.when(k == 0)
    def _init():
        acc_ref[...] = jnp.zeros_like(acc_ref)

    acc_ref[...] += jnp.dot(a_ref[...], w_ref[...],
                            preferred_element_type=jnp.float32)

    @pl.when(k == pl.num_programs(2) - 1)
    def _epilogue():
        acc = acc_ref[...] + b_ref[...]
        if slope is not None:
            acc = jnp.maximum(acc, acc * slope)
        proj = jnp.dot(xs_ref[...], wp_ref[...],
                       preferred_element_type=jnp.float32) + bp_ref[...]
        o_ref[...] = ((acc + proj) * res_scale).astype(o_ref.dtype)


# --------------------------- matmul wrapper ---------------------------------

def _round_up(x, m):
    return ((x + m - 1) // m) * m


def _fit_dim(dim, tile_cfg, align):
    """Return (padded_dim, tile) with align | tile and tile | padded_dim."""
    dp = _round_up(dim, align)
    if dp <= tile_cfg:
        return dp, dp
    return _round_up(dp, tile_cfg), tile_cfg


def _pad2d(x, rows, cols):
    pr, pc = rows - x.shape[0], cols - x.shape[1]
    if pr == 0 and pc == 0:
        return x
    return jnp.pad(x, ((0, pr), (0, pc)))


def _tiles_for_device():
    """Generation-specific (tm, tk, tn). Tiles are clamped to the problem size."""
    try:
        kind = jax.devices()[0].device_kind.lower()
    except Exception:
        kind = ""
    if "v7" in kind:                       # 64 MiB VMEM: keep tiles modest
        return 256, 512, 256
    if "v5" in kind and ("lite" in kind or "e" in kind):
        return 512, 512, 256               # v5e: 128-wide MXU, 1 vst slot
    return 512, 1024, 256                  # v6e default: big tiles, 128 MiB VMEM


def pallas_matmul(a, w, b, *, slope=None,
                  proj_a=None, proj_w=None, proj_b=None, res_scale=1.0,
                  out_dtype=jnp.float32):
    """act(a @ w + b) [+ (proj_a @ proj_w + proj_b), * res_scale] as a tiled Pallas call.

    a may have extra zero-padded K columns (a.shape[1] >= w.shape[0]).
    """
    M, Ka = a.shape
    Kw, N = w.shape
    assert Ka >= Kw, (Ka, Kw)

    tm_c, tk_c, tn_c = _tiles_for_device()
    Mp, tm = _fit_dim(M, tm_c, 8)
    Kp, tk = _fit_dim(Ka, tk_c, 128)
    Np, tn = _fit_dim(N, tn_c, 128)

    a_p = _pad2d(a.astype(jnp.bfloat16), Mp, Kp)
    w_p = _pad2d(w.astype(jnp.bfloat16), Kp, Np)
    b_p = _pad2d(b.reshape(1, -1).astype(jnp.float32), 1, Np)

    grid = (Mp // tm, Np // tn, Kp // tk)

    a_spec = pl.BlockSpec((tm, tk), lambda i, j, k: (i, k))
    w_spec = pl.BlockSpec((tk, tn), lambda i, j, k: (k, j))
    b_spec = pl.BlockSpec((1, tn), lambda i, j, k: (0, j))
    o_spec = pl.BlockSpec((tm, tn), lambda i, j, k: (i, j))

    flops = 2 * Mp * Np * Kp
    bytes_accessed = (a_p.size * 2 + w_p.size * 2 + b_p.size * 4
                      + Mp * Np * jnp.dtype(out_dtype).itemsize)

    if proj_a is None:
        kern = functools.partial(_mm_kernel, slope=slope)
        in_specs = [a_spec, w_spec, b_spec]
        args = (a_p, w_p, b_p)
    else:
        Kr = proj_a.shape[1]
        Krp = _round_up(Kr, 128)
        xs_p = _pad2d(proj_a.astype(jnp.bfloat16), Mp, Krp)
        wp_p = _pad2d(proj_w.astype(jnp.bfloat16), Krp, Np)
        bp_p = _pad2d(proj_b.reshape(1, -1).astype(jnp.float32), 1, Np)
        kern = functools.partial(_mm_proj_kernel, slope=slope, res_scale=res_scale)
        in_specs = [a_spec, w_spec, b_spec,
                    pl.BlockSpec((tm, Krp), lambda i, j, k: (i, 0)),
                    pl.BlockSpec((Krp, tn), lambda i, j, k: (0, j)),
                    pl.BlockSpec((1, tn), lambda i, j, k: (0, j))]
        args = (a_p, w_p, b_p, xs_p, wp_p, bp_p)
        flops += 2 * Mp * Np * Krp
        bytes_accessed += xs_p.size * 2 + wp_p.size * 2 + bp_p.size * 4

    out = pl.pallas_call(
        kern,
        out_shape=jax.ShapeDtypeStruct((Mp, Np), out_dtype),
        grid_spec=pltpu.PrefetchScalarGridSpec(
            num_scalar_prefetch=0,
            grid=grid,
            in_specs=in_specs,
            out_specs=o_spec,
            scratch_shapes=[pltpu.VMEM((tm, tn), jnp.float32)],
        ),
        compiler_params=pltpu.CompilerParams(
            dimension_semantics=("parallel", "parallel", "arbitrary")),
        cost_estimate=pl.CostEstimate(flops=flops, transcendentals=0,
                                      bytes_accessed=bytes_accessed),
    )(*args)
    return out[:M, :N]


# ------------------------------- JAX glue ----------------------------------

def _add_coords(x):
    """AddCoords(with_r=False) on NHWC.

    Matches the PyTorch reference exactly: with NCHW input (B, C, x_dim, y_dim),
    xx varies along x_dim (=H here) normalized by (H-1), yy varies along y_dim
    (=W) normalized by (W-1); channels appended after the input channels.
    """
    B, H, W, _ = x.shape
    xx = ((jnp.arange(H, dtype=jnp.float32) / (H - 1)) * 2.0 - 1.0).astype(x.dtype)
    yy = ((jnp.arange(W, dtype=jnp.float32) / (W - 1)) * 2.0 - 1.0).astype(x.dtype)
    xx = jnp.broadcast_to(xx[None, :, None, None], (B, H, W, 1))
    yy = jnp.broadcast_to(yy[None, None, :, None], (B, H, W, 1))
    return jnp.concatenate([x, xx, yy], axis=-1)


def _im2col(x, k, stride, pad, k_align=128):
    """NHWC -> (B*Ho*Wo, round_up(k*k*C, 128)) bf16 patches, patch order (dy,dx,c).

    The K (lane) padding is folded into the single concatenate (no extra full
    matrix copy), and everything is built in bf16 to halve glue HBM traffic.
    """
    B, H, W, C = x.shape
    x = x.astype(jnp.bfloat16)
    if pad:
        x = jnp.pad(x, ((0, 0), (pad, pad), (pad, pad), (0, 0)))
    Hp, Wp = H + 2 * pad, W + 2 * pad
    Ho = (Hp - k) // stride + 1
    Wo = (Wp - k) // stride + 1
    cols = []
    for dy in range(k):
        for dx in range(k):
            cols.append(x[:, dy:dy + (Ho - 1) * stride + 1:stride,
                          dx:dx + (Wo - 1) * stride + 1:stride, :])
    kk = k * k * C
    kkp = _round_up(kk, k_align)
    if kkp > kk:
        cols.append(jnp.zeros((B, Ho, Wo, kkp - kk), jnp.bfloat16))
    patches = jnp.concatenate(cols, axis=-1)
    return patches.reshape(B * Ho * Wo, kkp), (B, Ho, Wo)


def conv2d(x, w, b, *, k, stride=1, pad=0, slope=None,
           proj_x=None, proj_w=None, proj_b=None, res_scale=1.0,
           out_dtype=jnp.float32):
    a, (B, Ho, Wo) = _im2col(x, k, stride, pad)
    pa = None if proj_x is None else proj_x.reshape(B * Ho * Wo, proj_x.shape[-1])
    out = pallas_matmul(a, w, b, slope=slope,
                        proj_a=pa, proj_w=proj_w, proj_b=proj_b,
                        res_scale=res_scale, out_dtype=out_dtype)
    return out.reshape(B, Ho, Wo, -1)


def coord_conv(x, w, b, **kw):
    return conv2d(_add_coords(x), w, b, **kw)


def residual_cc_block_first_down(params, x_nchw):
    """Forward of ResidualCCBlock_FirstDown. Input/output are NCHW like PyTorch."""
    x = jnp.transpose(x_nchw.astype(jnp.float32), (0, 2, 3, 1))       # NHWC
    # CoordConv 3x3 stride-2 pad-1 + LeakyReLU  (bf16 intermediate activation)
    y = coord_conv(x, params['w1'], params['b1'], k=3, stride=2, pad=1,
                   slope=LRELU_SLOPE, out_dtype=jnp.bfloat16)
    # CoordConv 3x3 stride-1 pad-1 + LeakyReLU, with the proj 1x1 stride-2
    # residual and the 1/sqrt(2) scale fused into the same kernel's epilogue.
    xs = x[:, ::2, ::2, :]                                            # proj input samples
    y = coord_conv(y, params['w2'], params['b2'], k=3, stride=1, pad=1,
                   slope=LRELU_SLOPE,
                   proj_x=xs, proj_w=params['wp'], proj_b=params['bp'],
                   res_scale=SQRT2_INV, out_dtype=jnp.float32)
    return jnp.transpose(y, (0, 3, 1, 2))                             # back to NCHW


# --------------------------- pure-JAX reference ------------------------------

def _ref_forward(params, x_nchw):
    """f32 reference with lax.conv (for correctness check of the Pallas path)."""
    x = jnp.transpose(x_nchw.astype(jnp.float32), (0, 2, 3, 1))

    def conv(inp, w, b, k, stride, pad):
        w4 = w.reshape(k, k, -1, w.shape[-1])            # (dy,dx,c) -> HWIO
        out = jax.lax.conv_general_dilated(
            inp, w4, (stride, stride), [(pad, pad), (pad, pad)],
            dimension_numbers=('NHWC', 'HWIO', 'NHWC'),
            precision=jax.lax.Precision.HIGHEST)
        return out + b

    def lrelu(v):
        return jnp.where(v >= 0, v, v * LRELU_SLOPE)

    y = lrelu(conv(_add_coords(x), params['w1'], params['b1'], 3, 2, 1))
    y = lrelu(conv(_add_coords(y), params['w2'], params['b2'], 3, 1, 1))
    identity = conv(x[:, ::2, ::2, :], params['wp'], params['bp'], 1, 1, 0)
    out = (y + identity) * SQRT2_INV
    return jnp.transpose(out, (0, 3, 1, 2))


# --------------------------- deterministic init ----------------------------

def _kaiming_leaky_normal(key, fan_in, shape, a=0.2):
    gain = math.sqrt(2.0 / (1.0 + a * a))
    return jax.random.normal(key, shape, dtype=jnp.float32) * (gain / math.sqrt(fan_in))


def _uniform_fan_in(key, fan_in, shape):
    bound = 1.0 / math.sqrt(fan_in)
    return jax.random.uniform(key, shape, jnp.float32, -bound, bound)


def init_params(key, inplanes, planes):
    k1_in = (inplanes + 2) * 9              # CoordConv adds 2 channels, 3x3 kernel
    k2_in = (planes + 2) * 9

    def nk(i):
        return jax.random.fold_in(key, i)

    return {
        'w1': _kaiming_leaky_normal(nk(0), k1_in, (k1_in, planes)),
        'b1': _uniform_fan_in(nk(1), k1_in, (planes,)),
        'w2': _kaiming_leaky_normal(nk(2), k2_in, (k2_in, planes)),
        'b2': _uniform_fan_in(nk(3), k2_in, (planes,)),
        'wp': _uniform_fan_in(nk(4), inplanes, (inplanes, planes)),   # proj keeps default init
        'bp': _uniform_fan_in(nk(5), inplanes, (planes,)),
    }


# --------------------------------- main -------------------------------------

if __name__ == "__main__":
    key = jax.random.PRNGKey(0)
    B, Cin, H, W = 2, 4, 16, 16
    planes = 32

    x = jax.random.normal(jax.random.fold_in(key, 100), (B, Cin, H, W), dtype=jnp.float32)
    params = init_params(jax.random.fold_in(key, 1), Cin, planes)

    fwd = jax.jit(residual_cc_block_first_down)
    out = jax.block_until_ready(fwd(params, x))

    assert out.shape == (B, planes, H // 2, W // 2), out.shape
    assert bool(jnp.all(jnp.isfinite(out)))

    ref = _ref_forward(params, x)
    rel_err = float(jnp.max(jnp.abs(out - ref)) / (jnp.max(jnp.abs(ref)) + 1e-6))
    assert rel_err < 0.05, f"Pallas output mismatch vs f32 reference: rel_err={rel_err}"

    print("KERNEL_OK")
</pallas_src>

<mosaic_0001>
module attributes {stable_mosaic.version = 11 : i64} {
  func.func @_mm_kernel(%arg0: i32, %arg1: i32, %arg2: i32, %arg3: memref<128x128xbf16, #tpu.memory_space<vmem>>, %arg4: memref<128x128xbf16, #tpu.memory_space<vmem>>, %arg5: memref<1x128xf32, #tpu.memory_space<vmem>>, %arg6: memref<128x128xbf16, #tpu.memory_space<vmem>>, %arg7: memref<128x128xf32, #tpu.memory_space<vmem>>) attributes {dimension_semantics = [#tpu.dimension_semantics<parallel>, #tpu.dimension_semantics<parallel>, #tpu.dimension_semantics<arbitrary>], iteration_bounds = array<i64: 1, 1, 1>, scalar_prefetch = 0 : i64, scratch_operands = 1 : i64, tpu.core_type = #tpu.core_type<tc>, window_params = [{transform_indices = @transform_0, window_bounds = array<i64: 128, 128>}, {transform_indices = @transform_1, window_bounds = array<i64: 128, 128>}, {transform_indices = @transform_2, window_bounds = array<i64: 1, 128>}, {transform_indices = @transform_3, window_bounds = array<i64: 128, 128>}]} {
    %c0_i32 = arith.constant 0 : i32
    %0 = arith.cmpi eq, %arg2, %c0_i32 : i32
    %1 = arith.extui %0 : i1 to i32
    %c0_i32_0 = arith.constant 0 : i32
    %2 = arith.cmpi ne, %1, %c0_i32_0 : i32
    scf.if %2 {
      %cst_10 = arith.constant 0.000000e+00 : f32
      %12 = vector.broadcast %cst_10 : f32 to vector<128x128xf32>
      %c0_11 = arith.constant 0 : index
      %c0_12 = arith.constant 0 : index
      %13 = vector.load %arg7[%c0_11, %c0_12] : memref<128x128xf32, #tpu.memory_space<vmem>>, vector<128x128xf32>
      tpu.vector_store %arg7[%c0_11, %c0_12], %12 {strides = array<i32>} : memref<128x128xf32, #tpu.memory_space<vmem>>, vector<128x128xf32>,
    } else {
    }
    %c0 = arith.constant 0 : index
    %c0_1 = arith.constant 0 : index
    %3 = vector.load %arg7[%c0, %c0_1] : memref<128x128xf32, #tpu.memory_space<vmem>>, vector<128x128xf32>
    %c0_2 = arith.constant 0 : index
    %c0_3 = arith.constant 0 : index
    %4 = vector.load %arg3[%c0_2, %c0_3] : memref<128x128xbf16, #tpu.memory_space<vmem>>, vector<128x128xbf16>
    %c0_4 = arith.constant 0 : index
    %c0_5 = arith.constant 0 : index
    %5 = vector.load %arg4[%c0_4, %c0_5] : memref<128x128xbf16, #tpu.memory_space<vmem>>, vector<128x128xbf16>
    %cst = arith.constant dense<0.000000e+00> : vector<128x128xf32>
    %6 = tpu.matmul %4, %5, %cst {dimension_numbers = #tpu.dot_dimension_numbers<[1], [0], [0], [1], [0, 0, 1, 1], [], []>} : vector<128x128xbf16>, vector<128x128xbf16>, vector<128x128xf32> -> vector<128x128xf32>
    %7 = arith.addf %3, %6 : vector<128x128xf32>
    %c0_6 = arith.constant 0 : index
    %c0_7 = arith.constant 0 : index
    %8 = vector.load %arg7[%c0_6, %c0_7] : memref<128x128xf32, #tpu.memory_space<vmem>>, vector<128x128xf32>
    tpu.vector_store %arg7[%c0_6, %c0_7], %7 {strides = array<i32>} : memref<128x128xf32, #tpu.memory_space<vmem>>, vector<128x128xf32>,
    %c0_i32_8 = arith.constant 0 : i32
    %9 = arith.cmpi eq, %arg2, %c0_i32_8 : i32
    %10 = arith.extui %9 : i1 to i32
    %c0_i32_9 = arith.constant 0 : i32
    %11 = arith.cmpi ne, %10, %c0_i32_9 : i32
    scf.if %11 {
      %c0_10 = arith.constant 0 : index
      %c0_11 = arith.constant 0 : index
      %12 = vector.load %arg7[%c0_10, %c0_11] : memref<128x128xf32, #tpu.memory_space<vmem>>, vector<128x128xf32>
      %c0_12 = arith.constant 0 : index
      %c0_13 = arith.constant 0 : index
      %13 = vector.load %arg5[%c0_12, %c0_13] : memref<1x128xf32, #tpu.memory_space<vmem>>, vector<1x128xf32>
      %14 = vector.broadcast %13 : vector<1x128xf32> to vector<128x128xf32>
      %15 = arith.addf %12, %14 : vector<128x128xf32>
      %cst_14 = arith.constant 2.000000e-01 : f32
      %16 = vector.broadcast %cst_14 : f32 to vector<128x128xf32>
      %17 = arith.mulf %15, %16 : vector<128x128xf32>
      %18 = arith.maximumf %15, %17 : vector<128x128xf32>
      %19 = arith.truncf %18 : vector<128x128xf32> to vector<128x128xbf16>
      %c0_15 = arith.constant 0 : index
      %c0_16 = arith.constant 0 : index
      %20 = vector.load %arg6[%c0_15, %c0_16] : memref<128x128xbf16, #tpu.memory_space<vmem>>, vector<128x128xbf16>
      tpu.vector_store %arg6[%c0_15, %c0_16], %19 {strides = array<i32>} : memref<128x128xbf16, #tpu.memory_space<vmem>>, vector<128x128xbf16>,
    } else {
    }
    return
  }
  func.func @transform_0(%arg0: i32, %arg1: i32, %arg2: i32) -> (i32, i32) {
    %c0_i32 = arith.constant 0 : i32
    return %arg0, %arg2 : i32, i32
  }
  func.func @transform_1(%arg0: i32, %arg1: i32, %arg2: i32) -> (i32, i32) {
    %c0_i32 = arith.constant 0 : i32
    return %arg2, %arg1 : i32, i32
  }
  func.func @transform_2(%arg0: i32, %arg1: i32, %arg2: i32) -> (i32, i32) {
    %c0_i32 = arith.constant 0 : i32
    %c0_i32_0 = arith.constant 0 : i32
    return %c0_i32, %arg1 : i32, i32
  }
  func.func @transform_3(%arg0: i32, %arg1: i32, %arg2: i32) -> (i32, i32) {
    %c0_i32 = arith.constant 0 : i32
    return %arg0, %arg1 : i32, i32
  }
}

module attributes {stable_mosaic.version = 11 : i64} {
  func.func @_mm_proj_kernel(%arg0: i32, %arg1: i32, %arg2: i32, %arg3: memref<128x384xbf16, #tpu.memory_space<vmem>>, %arg4: memref<384x128xbf16, #tpu.memory_space<vmem>>, %arg5: memref<1x128xf32, #tpu.memory_space<vmem>>, %arg6: memref<128x128xbf16, #tpu.memory_space<vmem>>, %arg7: memref<128x128xbf16, #tpu.memory_space<vmem>>, %arg8: memref<1x128xf32, #tpu.memory_space<vmem>>, %arg9: memref<128x128xf32, #tpu.memory_space<vmem>>, %arg10: memref<128x128xf32, #tpu.memory_space<vmem>>) attributes {dimension_semantics = [#tpu.dimension_semantics<parallel>, #tpu.dimension_semantics<parallel>, #tpu.dimension_semantics<arbitrary>], iteration_bounds = array<i64: 1, 1, 1>, scalar_prefetch = 0 : i64, scratch_operands = 1 : i64, tpu.core_type = #tpu.core_type<tc>, window_params = [{transform_indices = @transform_0, window_bounds = array<i64: 128, 384>}, {transform_indices = @transform_1, window_bounds = array<i64: 384, 128>}, {transform_indices = @transform_2, window_bounds = array<i64: 1, 128>}, {transform_indices = @transform_3, window_bounds = array<i64: 128, 128>}, {transform_indices = @transform_4, window_bounds = array<i64: 128, 128>}, {transform_indices = @transform_5, window_bounds = array<i64: 1, 128>}, {transform_indices = @transform_6, window_bounds = array<i64: 128, 128>}]} {
    %c0_i32 = arith.constant 0 : i32
    %0 = arith.cmpi eq, %arg2, %c0_i32 : i32
    %1 = arith.extui %0 : i1 to i32
    %c0_i32_0 = arith.constant 0 : i32
    %2 = arith.cmpi ne, %1, %c0_i32_0 : i32
    scf.if %2 {
      %cst_10 = arith.constant 0.000000e+00 : f32
      %12 = vector.broadcast %cst_10 : f32 to vector<128x128xf32>
      %c0_11 = arith.constant 0 : index
      %c0_12 = arith.constant 0 : index
      %13 = vector.load %arg10[%c0_11, %c0_12] : memref<128x128xf32, #tpu.memory_space<vmem>>, vector<128x128xf32>
      tpu.vector_store %arg10[%c0_11, %c0_12], %12 {strides = array<i32>} : memref<128x128xf32, #tpu.memory_space<vmem>>, vector<128x128xf32>,
    } else {
    }
    %c0 = arith.constant 0 : index
    %c0_1 = arith.constant 0 : index
    %3 = vector.load %arg10[%c0, %c0_1] : memref<128x128xf32, #tpu.memory_space<vmem>>, vector<128x128xf32>
    %c0_2 = arith.constant 0 : index
    %c0_3 = arith.constant 0 : index
    %4 = vector.load %arg3[%c0_2, %c0_3] : memref<128x384xbf16, #tpu.memory_space<vmem>>, vector<128x384xbf16>
    %c0_4 = arith.constant 0 : index
    %c0_5 = arith.constant 0 : index
    %5 = vector.load %arg4[%c0_4, %c0_5] : memref<384x128xbf16, #tpu.memory_space<vmem>>, vector<384x128xbf16>
    %cst = arith.constant dense<0.000000e+00> : vector<128x128xf32>
    %6 = tpu.matmul %4, %5, %cst {dimension_numbers = #tpu.dot_dimension_numbers<[1], [0], [0], [1], [0, 0, 1, 1], [], []>} : vector<128x384xbf16>, vector<384x128xbf16>, vector<128x128xf32> -> vector<128x128xf32>
    %7 = arith.addf %3, %6 : vector<128x128xf32>
    %c0_6 = arith.constant 0 : index
    %c0_7 = arith.constant 0 : index
    %8 = vector.load %arg10[%c0_6, %c0_7] : memref<128x128xf32, #tpu.memory_space<vmem>>, vector<128x128xf32>
    tpu.vector_store %arg10[%c0_6, %c0_7], %7 {strides = array<i32>} : memref<128x128xf32, #tpu.memory_space<vmem>>, vector<128x128xf32>,
    %c0_i32_8 = arith.constant 0 : i32
    %9 = arith.cmpi eq, %arg2, %c0_i32_8 : i32
    %10 = arith.extui %9 : i1 to i32
    %c0_i32_9 = arith.constant 0 : i32
    %11 = arith.cmpi ne, %10, %c0_i32_9 : i32
    scf.if %11 {
      %c0_10 = arith.constant 0 : index
      %c0_11 = arith.constant 0 : index
      %12 = vector.load %arg10[%c0_10, %c0_11] : memref<128x128xf32, #tpu.memory_space<vmem>>, vector<128x128xf32>
      %c0_12 = arith.constant 0 : index
      %c0_13 = arith.constant 0 : index
      %13 = vector.load %arg5[%c0_12, %c0_13] : memref<1x128xf32, #tpu.memory_space<vmem>>, vector<1x128xf32>
      %14 = vector.broadcast %13 : vector<1x128xf32> to vector<128x128xf32>
      %15 = arith.addf %12, %14 : vector<128x128xf32>
      %cst_14 = arith.constant 2.000000e-01 : f32
      %16 = vector.broadcast %cst_14 : f32 to vector<128x128xf32>
      %17 = arith.mulf %15, %16 : vector<128x128xf32>
      %18 = arith.maximumf %15, %17 : vector<128x128xf32>
      %c0_15 = arith.constant 0 : index
      %c0_16 = arith.constant 0 : index
      %19 = vector.load %arg6[%c0_15, %c0_16] : memref<128x128xbf16, #tpu.memory_space<vmem>>, vector<128x128xbf16>
      %c0_17 = arith.constant 0 : index
      %c0_18 = arith.constant 0 : index
      %20 = vector.load %arg7[%c0_17, %c0_18] : memref<128x128xbf16, #tpu.memory_space<vmem>>, vector<128x128xbf16>
      %cst_19 = arith.constant dense<0.000000e+00> : vector<128x128xf32>
      %21 = tpu.matmul %19, %20, %cst_19 {dimension_numbers = #tpu.dot_dimension_numbers<[1], [0], [0], [1], [0, 0, 1, 1], [], []>} : vector<128x128xbf16>, vector<128x128xbf16>, vector<128x128xf32> -> vector<128x128xf32>
      %c0_20 = arith.constant 0 : index
      %c0_21 = arith.constant 0 : index
      %22 = vector.load %arg8[%c0_20, %c0_21] : memref<1x128xf32, #tpu.memory_space<vmem>>, vector<1x128xf32>
      %23 = vector.broadcast %22 : vector<1x128xf32> to vector<128x128xf32>
      %24 = arith.addf %21, %23 : vector<128x128xf32>
      %25 = arith.addf %18, %24 : vector<128x128xf32>
      %cst_22 = arith.constant 0.707106769 : f32
      %26 = vector.broadcast %cst_22 : f32 to vector<128x128xf32>
      %27 = arith.mulf %25, %26 : vector<128x128xf32>
      %c0_23 = arith.constant 0 : index
      %c0_24 = arith.constant 0 : index
      %28 = vector.load %arg9[%c0_23, %c0_24] : memref<128x128xf32, #tpu.memory_space<vmem>>, vector<128x128xf32>
      tpu.vector_store %arg9[%c0_23, %c0_24], %27 {strides = array<i32>} : memref<128x128xf32, #tpu.memory_space<vmem>>, vector<128x128xf32>,
    } else {
    }
    return
  }
  func.func @transform_0(%arg0: i32, %arg1: i32, %arg2: i32) -> (i32, i32) {
    %c0_i32 = arith.constant 0 : i32
    return %arg0, %arg2 : i32, i32
  }
  func.func @transform_1(%arg0: i32, %arg1: i32, %arg2: i32) -> (i32, i32) {
    %c0_i32 = arith.constant 0 : i32
    return %arg2, %arg1 : i32, i32
  }
  func.func @transform_2(%arg0: i32, %arg1: i32, %arg2: i32) -> (i32, i32) {
    %c0_i32 = arith.constant 0 : i32
    %c0_i32_0 = arith.constant 0 : i32
    return %c0_i32, %arg1 : i32, i32
  }
  func.func @transform_3(%arg0: i32, %arg1: i32, %arg2: i32) -> (i32, i32) {
    %c0_i32 = arith.constant 0 : i32
    %c0_i32_0 = arith.constant 0 : i32
    return %arg0, %c0_i32 : i32, i32
  }
  func.func @transform_4(%arg0: i32, %arg1: i32, %arg2: i32) -> (i32, i32) {
    %c0_i32 = arith.constant 0 : i32
    %c0_i32_0 = arith.constant 0 : i32
    return %c0_i32, %arg1 : i32, i32
  }
  func.func @transform_5(%arg0: i32, %arg1: i32, %arg2: i32) -> (i32, i32) {
    %c0_i32 = arith.constant 0 : i32
    %c0_i32_0 = arith.constant 0 : i32
    return %c0_i32, %arg1 : i32, i32
  }
  func.func @transform_6(%arg0: i32, %arg1: i32, %arg2: i32) -> (i32, i32) {
    %c0_i32 = arith.constant 0 : i32
    return %arg0, %arg1 : i32, i32
  }
}

</mosaic_0001>

<bundles_post_ra>
// kernel: residual_cc_block_first_down.2
= control target key start
LH: loop header
LB: loop body
LE: loop exit
PB: predicated region body
PF: predicated region fallthrough
CT: control target
= control target key end

     0   :  { %s631_s1 = inlined_call_operand.vmem [shape: bf16[128,128], index: 1, kind: input, shape index: {}]   ;;  %s632_s2 = inlined_call_operand.vmem [shape: f32[1,128], index: 2, kind: input, shape index: {}]   ;;  %s633_s0 = inlined_call_operand.vmem [shape: bf16[128,128], index: 0, kind: input, shape index: {}]   ;;  %s634_s3 = inlined_call_operand.vmem [shape: bf16[128,128], index: 3, kind: output, shape index: {}]  }
   0x1   :  { %v445_v0 = vld [vmem:[%s631_s1 + $0x38] sm:$0xff]  ;;  %v444_v1 = vld [vmem:[%s631_s1 + $0x30] sm:$0xff]  ;;  %v443_v2 = vld [vmem:[%s631_s1 + $0x28] sm:$0xff] }
   0x2   :  { %178 = vmatpush.bf16.msra.mxu0 %v445_v0  ;;  %493 = vmatpush.bf16.msra.mxu1 %v445_v0  ;;  %v442_v3 = vld [vmem:[%s631_s1 + $0x20] sm:$0xff]  ;;  %v441_v4 = vld [vmem:[%s631_s1 + $0x18] sm:$0xff]  ;;  %v440_v5 = vld [vmem:[%s631_s1 + $0x10] sm:$0xff] }
   0x3   :  { %494 = vmatpush.bf16.msra.mxu2 %v445_v0  ;;  %495 = vmatpush.bf16.msra.mxu3 %v445_v0  ;;  %v439_v6 = vld [vmem:[%s631_s1 + $0x8] sm:$0xff]  ;;  %v438_v7 = vld [vmem:[%s631_s1] sm:$0xff]  ;;  %v432_v9 = vld [vmem:[%s633_s0 + $0x10] sm:$0xff] }
   0x4   :  { %v430_v8 = vld [vmem:[%s633_s0] sm:$0xff]  ;;  %v436_v11 = vld [vmem:[%s633_s0 + $0x30] sm:$0xff]  ;;  %v431_v12 = vld [vmem:[%s633_s0 + $0x8] sm:$0xff] }
   0x5   :  { %v434_v10 = vld [vmem:[%s633_s0 + $0x20] sm:$0xff]  ;;  %v433_v13 = vld [vmem:[%s633_s0 + $0x18] sm:$0xff]  ;;  %v435_v14 = vld [vmem:[%s633_s0 + $0x28] sm:$0xff] }
   0x6   :  { %179 = vmatpush.bf16.msra.mxu0 %v444_v1  ;;  %496 = vmatpush.bf16.msra.mxu1 %v444_v1  ;;  %v437_v15 = vld [vmem:[%s633_s0 + $0x38] sm:$0xff]  ;;  %v589_v18 = vld [vmem:[%s632_s2] ss:$0 sm:$0xff] }
   0x7   :  { %497 = vmatpush.bf16.msra.mxu2 %v444_v1  ;;  %498 = vmatpush.bf16.msra.mxu3 %v444_v1 }
   0xa   :  { %180 = vmatpush.bf16.msra.mxu0 %v443_v2  ;;  %499 = vmatpush.bf16.msra.mxu1 %v443_v2 }
   0xb   :  { %500 = vmatpush.bf16.msra.mxu2 %v443_v2  ;;  %501 = vmatpush.bf16.msra.mxu3 %v443_v2 }
   0xe   :  { %181 = vmatpush.bf16.msra.mxu0 %v442_v3  ;;  %502 = vmatpush.bf16.msra.mxu1 %v442_v3 }
   0xf   :  { %503 = vmatpush.bf16.msra.mxu2 %v442_v3  ;;  %504 = vmatpush.bf16.msra.mxu3 %v442_v3 }
  0x12   :  { %182 = vmatpush.bf16.msra.mxu0 %v441_v4  ;;  %505 = vmatpush.bf16.msra.mxu1 %v441_v4 }
  0x13   :  { %506 = vmatpush.bf16.msra.mxu2 %v441_v4  ;;  %507 = vmatpush.bf16.msra.mxu3 %v441_v4 }
  0x16   :  { %183 = vmatpush.bf16.msra.mxu0 %v440_v5  ;;  %508 = vmatpush.bf16.msra.mxu1 %v440_v5 }
  0x17   :  { %509 = vmatpush.bf16.msra.mxu2 %v440_v5  ;;  %510 = vmatpush.bf16.msra.mxu3 %v440_v5 }
  0x1a   :  { %184 = vmatpush.bf16.msra.mxu0 %v439_v6  ;;  %511 = vmatpush.bf16.msra.mxu1 %v439_v6 }
  0x1b   :  { %512 = vmatpush.bf16.msra.mxu2 %v439_v6  ;;  %513 = vmatpush.bf16.msra.mxu3 %v439_v6 }
  0x1e   :  { %185 = vmatpush.bf16.msra.mxu0 %v438_v7  ;;  %514 = vmatpush.bf16.msra.mxu1 %v438_v7 }
  0x1f   :  { %515 = vmatpush.bf16.msra.mxu2 %v438_v7  ;;  %516 = vmatpush.bf16.msra.mxu3 %v438_v7 }
  0x21   :  { %186 = vmatmul.bf16.vlgmr.msra.gmra.mxu0 %v430_v8  ;;  %196 = vmatmul.bf16.vlgmr.msra.gmra.mxu1 %v432_v9 }
  0x22   :  { %206 = vmatmul.bf16.vlgmr.msra.gmra.mxu2 %v434_v10  ;;  %216 = vmatmul.bf16.vlgmr.msra.gmra.mxu3 %v436_v11 }
  0x31   :  { %191 = vmatmul.bf16.gmra.mxu0 %v431_v12  ;;  %201 = vmatmul.bf16.gmra.mxu1 %v433_v13 }
  0x32   :  { %211 = vmatmul.bf16.gmra.mxu2 %v435_v14  ;;  %221 = vmatmul.bf16.gmra.mxu3 %v437_v15 }
  0x9e   :  { %v187_v16 = vpop.f32.mrf.mxu0  ;;  %v197_v17 = vpop.f32.mrf.mxu1 }
  0x9f   :  { %v282_v19 = vadd.f32 %v589_v18, %v187_v16  ;;  %v286_v20 = vadd.f32 %v589_v18, %v197_v17 }
  0xa1   :  { %v298_v25 = vmul.f32 0.2, %v282_v19  ;;  %v302_v26 = vmul.f32 0.2, %v286_v20 }
  0xa3   :  { %v314_v33 = vmax.f32 %v282_v19, %v298_v25  ;;  %v318_v34 = vmax.f32 %v286_v20, %v302_v26 }
  0xa5   :  { %v207_v21 = vpop.f32.mrf.mxu2  ;;  %v217_v22 = vpop.f32.mrf.mxu3 }
  0xa6   :  { %v189_v23 = vpop.f32.mrf.mxu0  ;;  %v199_v24 = vpop.f32.mrf.mxu1  ;;  %v290_v31 = vadd.f32 %v589_v18, %v207_v21  ;;  %v294_v32 = vadd.f32 %v589_v18, %v217_v22 }
  0xa7   :  { %v283_v27 = vadd.f32 %v589_v18, %v189_v23  ;;  %v287_v28 = vadd.f32 %v589_v18, %v199_v24 }
  0xa8   :  { %v306_v41 = vmul.f32 0.2, %v290_v31  ;;  %v310_v42 = vmul.f32 0.2, %v294_v32 }
  0xa9   :  { %v299_v29 = vmul.f32 0.2, %v283_v27  ;;  %v303_v30 = vmul.f32 0.2, %v287_v28 }
  0xaa   :  { %v322_v49 = vmax.f32 %v290_v31, %v306_v41  ;;  %v326_v50 = vmax.f32 %v294_v32, %v310_v42 }
  0xab   :  { %v315_v35 = vmax.f32 %v283_v27, %v299_v29  ;;  %v319_v36 = vmax.f32 %v287_v28, %v303_v30 }
  0xad   :  { %v449_v37 = vpack.c.bf16 %v315_v35, %v314_v33  ;;  %v459_v38 = vpack.c.bf16 %v319_v36, %v318_v34  ;;  %v209_v39 = vpop.f32.mrf.mxu2  ;;  %v219_v40 = vpop.f32.mrf.mxu3 }
  0xae   :  { %v291_v43 = vadd.f32 %v589_v18, %v209_v39  ;;  %v295_v44 = vadd.f32 %v589_v18, %v219_v40  ;;  %v192_v45 = vpop.f32.mrf.mxu0  ;;  %v202_v46 = vpop.f32.mrf.mxu1 }
  0xaf   :  { %450 = vst [vmem:[%s634_s3] sm:$0xff] %v449_v37   ;;  %v284_v53 = vadd.f32 %v589_v18, %v192_v45  ;;  %v288_v54 = vadd.f32 %v589_v18, %v202_v46 }
  0xb0   :  { %487 = vst [vmem:[%s634_s3 + $0x10] sm:$0xff] %v459_v38   ;;  %v307_v47 = vmul.f32 0.2, %v291_v43  ;;  %v311_v48 = vmul.f32 0.2, %v295_v44 }
  0xb1   :  { %v300_v61 = vmul.f32 0.2, %v284_v53  ;;  %v304_v62 = vmul.f32 0.2, %v288_v54 }
  0xb2   :  { %v323_v51 = vmax.f32 %v291_v43, %v307_v47  ;;  %v327_v52 = vmax.f32 %v295_v44, %v311_v48 }
  0xb3   :  { %v316_v5 = vmax.f32 %v284_v53, %v300_v61  ;;  %v320_v6 = vmax.f32 %v288_v54, %v304_v62 }
  0xb4   :  { %v469_v55 = vpack.c.bf16 %v323_v51, %v322_v49  ;;  %v479_v56 = vpack.c.bf16 %v327_v52, %v326_v50 }
  0xb5   :  { %v212_v57 = vpop.f32.mrf.mxu2  ;;  %v222_v58 = vpop.f32.mrf.mxu3 }
  0xb6   :  { %489 = vst [vmem:[%s634_s3 + $0x20] sm:$0xff] %v469_v55   ;;  %v194_v59 = vpop.f32.mrf.mxu0  ;;  %v204_v60 = vpop.f32.mrf.mxu1  ;;  %v292_v3 = vadd.f32 %v589_v18, %v212_v57  ;;  %v296_v4 = vadd.f32 %v589_v18, %v222_v58 }
  0xb7   :  { %491 = vst [vmem:[%s634_s3 + $0x30] sm:$0xff] %v479_v56   ;;  %v285_v63 = vadd.f32 %v589_v18, %v194_v59  ;;  %v289_v0 = vadd.f32 %v589_v18, %v204_v60 }
  0xb8   :  { %v308_v13 = vmul.f32 0.2, %v292_v3  ;;  %v312_v14 = vmul.f32 0.2, %v296_v4 }
  0xb9   :  { %v301_v1 = vmul.f32 0.2, %v285_v63  ;;  %v305_v2 = vmul.f32 0.2, %v289_v0 }
  0xba   :  { %v324_v20 = vmax.f32 %v292_v3, %v308_v13  ;;  %v328_v21 = vmax.f32 %v296_v4, %v312_v14 }
  0xbb   :  { %v317_v7 = vmax.f32 %v285_v63, %v301_v1  ;;  %v321_v8 = vmax.f32 %v289_v0, %v305_v2 }
  0xbd   :  { %v454_v9 = vpack.c.bf16 %v317_v7, %v316_v5  ;;  %v464_v10 = vpack.c.bf16 %v321_v8, %v320_v6  ;;  %v214_v11 = vpop.f32.mrf.mxu2  ;;  %v224_v12 = vpop.f32.mrf.mxu3 }
  0xbe   :  { %v293_v15 = vadd.f32 %v589_v18, %v214_v11  ;;  %v297_v16 = vadd.f32 %v589_v18, %v224_v12 }
  0xbf   :  { %486 = vst [vmem:[%s634_s3 + $0x8] sm:$0xff] %v454_v9  }
  0xc0   :  { %488 = vst [vmem:[%s634_s3 + $0x18] sm:$0xff] %v464_v10   ;;  %v309_v17 = vmul.f32 0.2, %v293_v15  ;;  %v313_v19 = vmul.f32 0.2, %v297_v16 }
  0xc2   :  { %v325_v22 = vmax.f32 %v293_v15, %v309_v17  ;;  %v329_v23 = vmax.f32 %v297_v16, %v313_v19 }
  0xc4   :  { %v474_v24 = vpack.c.bf16 %v325_v22, %v324_v20  ;;  %v484_v25 = vpack.c.bf16 %v329_v23, %v328_v21 }
  0xc6   :  { %490 = vst [vmem:[%s634_s3 + $0x28] sm:$0xff] %v474_v24  }
  0xc7   :  { %492 = vst [vmem:[%s634_s3 + $0x38] sm:$0xff] %v484_v25  }

// kernel: residual_cc_block_first_down.3
= control target key start
LH: loop header
LB: loop body
LE: loop exit
PB: predicated region body
PF: predicated region fallthrough
CT: control target
= control target key end

     0   :  { %s1607_s0 = inlined_call_operand.vmem [shape: bf16[128,384], index: 0, kind: input, shape index: {}]   ;;  %s1608_s1 = inlined_call_operand.vmem [shape: bf16[384,128], index: 1, kind: input, shape index: {}]   ;;  %s1609_s2 = inlined_call_operand.vmem [shape: f32[1,128], index: 2, kind: input, shape index: {}]   ;;  %s1610_s3 = inlined_call_operand.vmem [shape: bf16[128,128], index: 3, kind: input, shape index: {}]   ;;  %s1611_s4 = inlined_call_operand.vmem [shape: bf16[128,128], index: 4, kind: input, shape index: {}]   ;;  %s1612_s5 = inlined_call_operand.vmem [shape: f32[1,128], index: 5, kind: input, shape index: {}]   ;;  %s1613_s6 = inlined_call_operand.hbm [shape: f32[128,128], index: 6, kind: output, shape index: {}]  }
   0x1   :  { %v1196_v0 = vld [vmem:[%s1608_s1 + $0x38] sm:$0xff]  ;;  %v1195_v4 = vld [vmem:[%s1608_s1 + $0x30] sm:$0xff]  ;;  %v1194_v8 = vld [vmem:[%s1608_s1 + $0x28] sm:$0xff] }
   0x2   :  { %v1204_v1 = vld [vmem:[%s1608_s1 + $0x78] sm:$0xff]  ;;  %412 = vmatpush.bf16.msra.mxu0 %v1196_v0  ;;  %v1203_v5 = vld [vmem:[%s1608_s1 + $0x70] sm:$0xff]  ;;  %v1202_v9 = vld [vmem:[%s1608_s1 + $0x68] sm:$0xff] }
   0x3   :  { %v1212_v2 = vld [vmem:[%s1608_s1 + $0xb8] sm:$0xff]  ;;  %461 = vmatpush.bf16.msra.mxu1 %v1204_v1  ;;  %v1211_v6 = vld [vmem:[%s1608_s1 + $0xb0] sm:$0xff]  ;;  %v1210_v10 = vld [vmem:[%s1608_s1 + $0xa8] sm:$0xff] }
   0x4   :  { %v1228_v3 = vld [vmem:[%s1611_s4 + $0x38] sm:$0xff]  ;;  %510 = vmatpush.bf16.msra.mxu2 %v1212_v2  ;;  %v1227_v7 = vld [vmem:[%s1611_s4 + $0x30] sm:$0xff]  ;;  %v1226_v11 = vld [vmem:[%s1611_s4 + $0x28] sm:$0xff] }
   0x5   :  { %794 = vmatpush.bf16.msra.mxu3 %v1228_v3  ;;  %v1193_v12 = vld [vmem:[%s1608_s1 + $0x20] sm:$0xff]  ;;  %v1192_v16 = vld [vmem:[%s1608_s1 + $0x18] sm:$0xff] }
   0x6   :  { %413 = vmatpush.bf16.msra.mxu0 %v1195_v4  ;;  %v1201_v13 = vld [vmem:[%s1608_s1 + $0x60] sm:$0xff]  ;;  %v1200_v17 = vld [vmem:[%s1608_s1 + $0x58] sm:$0xff] }
   0x7   :  { %462 = vmatpush.bf16.msra.mxu1 %v1203_v5  ;;  %v1209_v14 = vld [vmem:[%s1608_s1 + $0xa0] sm:$0xff] }
   0x8   :  { %511 = vmatpush.bf16.msra.mxu2 %v1211_v6  ;;  %v1225_v15 = vld [vmem:[%s1611_s4 + $0x20] sm:$0xff] }
   0x9   :  { %795 = vmatpush.bf16.msra.mxu3 %v1227_v7 }
   0xa   :  { %414 = vmatpush.bf16.msra.mxu0 %v1194_v8 }
   0xb   :  { %463 = vmatpush.bf16.msra.mxu1 %v1202_v9 }
   0xc   :  { %512 = vmatpush.bf16.msra.mxu2 %v1210_v10 }
   0xd   :  { %796 = vmatpush.bf16.msra.mxu3 %v1226_v11 }
   0xe   :  { %415 = vmatpush.bf16.msra.mxu0 %v1193_v12 }
   0xf   :  { %464 = vmatpush.bf16.msra.mxu1 %v1201_v13 }
  0x10   :  { %11 = vsyncpa [#allocation4], 0  ;;  %513 = vmatpush.bf16.msra.mxu2 %v1209_v14  ;;  %v1208_v18 = vld [vmem:[%s1608_s1 + $0x98] sm:$0xff]  ;;  %v1191_v20 = vld [vmem:[%s1608_s1 + $0x10] sm:$0xff]  ;;  %s897_s24 = sshll.u32 %s1613_s6, 4  ;;  %s1261_s25 = smov 128   ;;  %s898_s24 = int_to_ptr.hbm [resolvable:$true] %s897_s24 }
  0x11   :  { %797 = vmatpush.bf16.msra.mxu3 %v1225_v15  ;;  %v1224_v19 = vld [vmem:[%s1611_s4 + $0x18] sm:$0xff]  ;;  %v1199_v21 = vld [vmem:[%s1608_s1 + $0x50] sm:$0xff]  ;;  %v1190_v24 = vld [vmem:[%s1608_s1 + $0x8] sm:$0xff] }
  0x12   :  { %416 = vmatpush.bf16.msra.mxu0 %v1192_v16  ;;  %v1207_v22 = vld [vmem:[%s1608_s1 + $0x90] sm:$0xff]  ;;  %v1198_v25 = vld [vmem:[%s1608_s1 + $0x48] sm:$0xff]  ;;  %v1189_v28 = vld [vmem:[%s1608_s1] sm:$0xff] }
  0x13   :  { %465 = vmatpush.bf16.msra.mxu1 %v1200_v17  ;;  %v1223_v23 = vld [vmem:[%s1611_s4 + $0x10] sm:$0xff]  ;;  %v1206_v26 = vld [vmem:[%s1608_s1 + $0x88] sm:$0xff]  ;;  %v1197_v29 = vld [vmem:[%s1608_s1 + $0x40] sm:$0xff] }
  0x14   :  { %514 = vmatpush.bf16.msra.mxu2 %v1208_v18  ;;  %v1222_v27 = vld [vmem:[%s1611_s4 + $0x8] sm:$0xff]  ;;  %v1205_v30 = vld [vmem:[%s1608_s1 + $0x80] sm:$0xff]  ;;  %v913_v34 = vld [vmem:[%s1607_s0 + $0xc] sm:$0xf0] }
  0x15   :  { %798 = vmatpush.bf16.msra.mxu3 %v1224_v19  ;;  %v911_v31 = vld [vmem:[%s1607_s0] sm:$0xf]  ;;  %v1166_v32 = vld [vmem:[%s1607_s0 + $0x8] sm:$0xf0]  ;;  %v1165_v33 = vld [vmem:[%s1607_s0 + $0x4] sm:$0xf] }
  0x16   :  { %417 = vmatpush.bf16.msra.mxu0 %v1191_v20  ;;  %v1221_v35 = vld [vmem:[%s1611_s4] sm:$0xff]  ;;  %v919_v36 = vld [vmem:[%s1607_s0 + $0x8] sm:$0xf]  ;;  %v1167_v37 = vld [vmem:[%s1607_s0 + $0x10] sm:$0xf0]  ;;  %v912_v38 = vor.u32 %v1166_v32, %v911_v31  ;;  %v916_v39 = vor.u32 %v1165_v33, %v913_v34  ;;  %s1262_s4 = smov 8  }
  0x17   :  { %466 = vmatpush.bf16.msra.mxu1 %v1199_v21  ;;  %v920_v40 = vor.u32 %v1167_v37, %v919_v36  ;;  %v1213_v41 = vld [vmem:[%s1610_s3] sm:$0xff]  ;;  %v923_v42 = vld [vmem:[%s1607_s0 + $0x18] sm:$0xf]  ;;  %v1168_v44 = vld [vmem:[%s1607_s0 + $0x1c] sm:$0xf] }
  0x18   :  { %515 = vmatpush.bf16.msra.mxu2 %v1207_v22  ;;  %v1169_v43 = vld [vmem:[%s1607_s0 + $0x20] sm:$0xf0]  ;;  %v925_v45 = vld [vmem:[%s1607_s0 + $0x24] sm:$0xf0]  ;;  %v931_v46 = vld [vmem:[%s1607_s0 + $0x20] sm:$0xf] }
  0x19   :  { %799 = vmatpush.bf16.msra.mxu3 %v1223_v23  ;;  %v1170_v47 = vld [vmem:[%s1607_s0 + $0x28] sm:$0xf0]  ;;  %v924_v48 = vor.u32 %v1169_v43, %v923_v42  ;;  %v928_v49 = vor.u32 %v1168_v44, %v925_v45  ;;  %v935_v52 = vld [vmem:[%s1607_s0 + $0x30] sm:$0xf]  ;;  %v1172_v53 = vld [vmem:[%s1607_s0 + $0x38] sm:$0xf0] }
  0x1a   :  { %418 = vmatpush.bf16.msra.mxu0 %v1190_v24  ;;  %v932_v50 = vor.u32 %v1170_v47, %v931_v46  ;;  %v1214_v51 = vld [vmem:[%s1610_s3 + $0x8] sm:$0xff]  ;;  %v1171_v54 = vld [vmem:[%s1607_s0 + $0x34] sm:$0xf]  ;;  %v937_v55 = vld [vmem:[%s1607_s0 + $0x3c] sm:$0xf0]  ;;  %v936_v58 = vor.u32 %v1172_v53, %v935_v52 }
  0x1b   :  { %467 = vmatpush.bf16.msra.mxu1 %v1198_v25  ;;  %v943_v56 = vld [vmem:[%s1607_s0 + $0x38] sm:$0xf]  ;;  %v1173_v57 = vld [vmem:[%s1607_s0 + $0x40] sm:$0xf0]  ;;  %v940_v59 = vor.u32 %v1171_v54, %v937_v55  ;;  %v1215_v61 = vld [vmem:[%s1610_s3 + $0x10] sm:$0xff] }
  0x1c   :  { %516 = vmatpush.bf16.msra.mxu2 %v1206_v26  ;;  %v944_v60 = vor.u32 %v1173_v57, %v943_v56  ;;  %v947_v62 = vld [vmem:[%s1607_s0 + $0x48] sm:$0xf]  ;;  %v1175_v63 = vld [vmem:[%s1607_s0 + $0x50] sm:$0xf0]  ;;  %v1174_v0 = vld [vmem:[%s1607_s0 + $0x4c] sm:$0xf] }
  0x1d   :  { %800 = vmatpush.bf16.msra.mxu3 %v1222_v27  ;;  %v949_v1 = vld [vmem:[%s1607_s0 + $0x54] sm:$0xf0]  ;;  %v955_v2 = vld [vmem:[%s1607_s0 + $0x50] sm:$0xf]  ;;  %v1176_v3 = vld [vmem:[%s1607_s0 + $0x58] sm:$0xf0]  ;;  %v948_v4 = vor.u32 %v1175_v63, %v947_v62 }
  0x1e   :  { %419 = vmatpush.bf16.msra.mxu0 %v1189_v28  ;;  %v952_v5 = vor.u32 %v1174_v0, %v949_v1  ;;  %v956_v6 = vor.u32 %v1176_v3, %v955_v2  ;;  %v1216_v7 = vld [vmem:[%s1610_s3 + $0x18] sm:$0xff]  ;;  %v959_v8 = vld [vmem:[%s1607_s0 + $0x60] sm:$0xf]  ;;  %v1178_v9 = vld [vmem:[%s1607_s0 + $0x68] sm:$0xf0] }
  0x1f   :  { %468 = vmatpush.bf16.msra.mxu1 %v1197_v29  ;;  %v1177_v10 = vld [vmem:[%s1607_s0 + $0x64] sm:$0xf]  ;;  %v961_v11 = vld [vmem:[%s1607_s0 + $0x6c] sm:$0xf0]  ;;  %v967_v12 = vld [vmem:[%s1607_s0 + $0x68] sm:$0xf]  ;;  %v960_v14 = vor.u32 %v1178_v9, %v959_v8 }
  0x20   :  { %517 = vmatpush.bf16.msra.mxu2 %v1205_v30  ;;  %v1179_v13 = vld [vmem:[%s1607_s0 + $0x70] sm:$0xf0]  ;;  %v964_v15 = vor.u32 %v1177_v10, %v961_v11  ;;  %v1217_v17 = vld [vmem:[%s1610_s3 + $0x20] sm:$0xff]  ;;  %v971_v18 = vld [vmem:[%s1607_s0 + $0x78] sm:$0xf] }
  0x21   :  { %801 = vmatpush.bf16.msra.mxu3 %v1221_v35  ;;  %420 = vmatmul.bf16.vlgmr.msra.gmra.mxu0 %v912_v38  ;;  %v968_v16 = vor.u32 %v1179_v13, %v967_v12  ;;  %v1181_v19 = vld [vmem:[%s1607_s0 + $0x80] sm:$0xf0]  ;;  %v1180_v20 = vld [vmem:[%s1607_s0 + $0x7c] sm:$0xf]  ;;  %v973_v21 = vld [vmem:[%s1607_s0 + $0x84] sm:$0xf0] }
  0x22   :  { %469 = vmatmul.bf16.vlgmr.msra.gmra.mxu1 %v916_v39  ;;  %v979_v22 = vld [vmem:[%s1607_s0 + $0x80] sm:$0xf]  ;;  %v1182_v23 = vld [vmem:[%s1607_s0 + $0x88] sm:$0xf0]  ;;  %v972_v24 = vor.u32 %v1181_v19, %v971_v18  ;;  %v976_v25 = vor.u32 %v1180_v20, %v973_v21  ;;  %v983_v28 = vld [vmem:[%s1607_s0 + $0x90] sm:$0xf] }
  0x23   :  { %518 = vmatmul.bf16.vlgmr.msra.gmra.mxu2 %v920_v40  ;;  %v980_v26 = vor.u32 %v1182_v23, %v979_v22  ;;  %v1218_v27 = vld [vmem:[%s1610_s3 + $0x28] sm:$0xff]  ;;  %v1184_v29 = vld [vmem:[%s1607_s0 + $0x98] sm:$0xf0]  ;;  %v1183_v30 = vld [vmem:[%s1607_s0 + $0x94] sm:$0xf] }
  0x24   :  { %802 = vmatmul.bf16.vlgmr.msra.gmra.mxu3 %v1213_v41  ;;  %v985_v31 = vld [vmem:[%s1607_s0 + $0x9c] sm:$0xf0]  ;;  %v991_v32 = vld [vmem:[%s1607_s0 + $0x98] sm:$0xf]  ;;  %v1185_v33 = vld [vmem:[%s1607_s0 + $0xa0] sm:$0xf0]  ;;  %v984_v34 = vor.u32 %v1184_v29, %v983_v28 }
  0x25   :  { %v988_v35 = vor.u32 %v1183_v30, %v985_v31  ;;  %v992_v36 = vor.u32 %v1185_v33, %v991_v32  ;;  %v1219_v37 = vld [vmem:[%s1610_s3 + $0x30] sm:$0xff]  ;;  %v995_v38 = vld [vmem:[%s1607_s0 + $0xa8] sm:$0xf]  ;;  %v1186_v40 = vld [vmem:[%s1607_s0 + $0xac] sm:$0xf] }
  0x26   :  { %v1187_v39 = vld [vmem:[%s1607_s0 + $0xb0] sm:$0xf0]  ;;  %v997_v41 = vld [vmem:[%s1607_s0 + $0xb4] sm:$0xf0]  ;;  %v1003_v42 = vld [vmem:[%s1607_s0 + $0xb0] sm:$0xf] }
  0x27   :  { %v1188_v43 = vld [vmem:[%s1607_s0 + $0xb8] sm:$0xf0]  ;;  %v996_v44 = vor.u32 %v1187_v39, %v995_v38  ;;  %v1000_v45 = vor.u32 %v1186_v40, %v997_v41  ;;  %v1570_v55 = vld [vmem:[%s1612_s5] ss:$0 sm:$0xff] }
  0x28   :  { %v1004_v46 = vor.u32 %v1188_v43, %v1003_v42  ;;  %v1220_v47 = vld [vmem:[%s1610_s3 + $0x38] sm:$0xff] }
  0x31   :  { %425 = vmatmul.bf16.gmra.mxu0 %v924_v48 }
  0x32   :  { %474 = vmatmul.bf16.gmra.mxu1 %v928_v49 }
  0x33   :  { %523 = vmatmul.bf16.gmra.mxu2 %v932_v50 }
  0x34   :  { %807 = vmatmul.bf16.gmra.mxu3 %v1214_v51  ;;  %v1565_v51 = vld [vmem:[%s1609_s2] ss:$0 sm:$0xff]  ;;  %s1260_s2 = smov [#allocation3]  }
  0x35   :  { %s895_s3 = sshll.u32 %s1260_s2, 4  ;;  %s896_s3 = int_to_ptr.vmem [resolvable:$true] %s895_s3 }
  0x41   :  { %430 = vmatmul.bf16.gmra.mxu0 %v936_v58 }
  0x42   :  { %479 = vmatmul.bf16.gmra.mxu1 %v940_v59 }
  0x43   :  { %528 = vmatmul.bf16.gmra.mxu2 %v944_v60 }
  0x44   :  { %812 = vmatmul.bf16.gmra.mxu3 %v1215_v61 }
  0x51   :  { %435 = vmatmul.bf16.gmra.mxu0 %v948_v4 }
  0x52   :  { %484 = vmatmul.bf16.gmra.mxu1 %v952_v5 }
  0x53   :  { %533 = vmatmul.bf16.gmra.mxu2 %v956_v6 }
  0x54   :  { %817 = vmatmul.bf16.gmra.mxu3 %v1216_v7 }
  0x61   :  { %440 = vmatmul.bf16.gmra.mxu0 %v960_v14 }
  0x62   :  { %489 = vmatmul.bf16.gmra.mxu1 %v964_v15 }
  0x63   :  { %538 = vmatmul.bf16.gmra.mxu2 %v968_v16 }
  0x64   :  { %822 = vmatmul.bf16.gmra.mxu3 %v1217_v17 }
  0x71   :  { %445 = vmatmul.bf16.gmra.mxu0 %v972_v24 }
  0x72   :  { %494 = vmatmul.bf16.gmra.mxu1 %v976_v25 }
  0x73   :  { %543 = vmatmul.bf16.gmra.mxu2 %v980_v26 }
  0x74   :  { %827 = vmatmul.bf16.gmra.mxu3 %v1218_v27 }
  0x81   :  { %450 = vmatmul.bf16.gmra.mxu0 %v984_v34 }
  0x82   :  { %499 = vmatmul.bf16.gmra.mxu1 %v988_v35 }
  0x83   :  { %548 = vmatmul.bf16.gmra.mxu2 %v992_v36 }
  0x84   :  { %832 = vmatmul.bf16.gmra.mxu3 %v1219_v37 }
  0x91   :  { %455 = vmatmul.bf16.gmra.mxu0 %v996_v44 }
  0x92   :  { %504 = vmatmul.bf16.gmra.mxu1 %v1000_v45 }
  0x93   :  { %553 = vmatmul.bf16.gmra.mxu2 %v1004_v46 }
  0x94   :  { %837 = vmatmul.bf16.gmra.mxu3 %v1220_v47 }
  0x9e   :  { %v421_v48 = vpop.f32.mrf.mxu0 }
  0x9f   :  { %v470_v49 = vpop.f32.mrf.mxu1 }
  0xa0   :  { %v471_v50 = vadd.f32 %v470_v49, %v421_v48 }
  0xa6   :  { %v519_v52 = vpop.f32.mrf.mxu2  ;;  %v423_v56 = vpop.f32.mrf.mxu0 }
  0xa7   :  { %v803_v53 = vpop.f32.mrf.mxu3  ;;  %v520_v54 = vadd.f32 %v519_v52, %v471_v50  ;;  %v472_v57 = vpop.f32.mrf.mxu1 }
  0xa8   :  { %v804_v60 = vadd.f32 %v1570_v55, %v803_v53  ;;  %v473_v62 = vadd.f32 %v472_v57, %v423_v56 }
  0xa9   :  { %v614_v58 = vadd.f32 %v1565_v51, %v520_v54 }
  0xab   :  { %v630_v59 = vmul.f32 0.2, %v614_v58 }
  0xad   :  { %v646_v61 = vmax.f32 %v614_v58, %v630_v59 }
  0xae   :  { %v521_v63 = vpop.f32.mrf.mxu2  ;;  %v426_v3 = vpop.f32.mrf.mxu0 }
  0xaf   :  { %v805_v0 = vpop.f32.mrf.mxu3  ;;  %v843_v1 = vadd.f32 %v804_v60, %v646_v61  ;;  %v522_v2 = vadd.f32 %v521_v63, %v473_v62  ;;  %v475_v4 = vpop.f32.mrf.mxu1 }
  0xb0   :  { %v476_v8 = vadd.f32 %v475_v4, %v426_v3  ;;  %v806_v10 = vadd.f32 %v1570_v55, %v805_v0 }
  0xb1   :  { %v859_v5 = vmul.f32 0.70710677, %v843_v1  ;;  %v615_v6 = vadd.f32 %v1565_v51, %v522_v2 }
  0xb3   :  { %875 = vst [vmem:[#allocation3] sm:$0xff] %v859_v5  ;;  %v631_v7 = vmul.f32 0.2, %v615_v6 }
  0xb5   :  { %v647_v9 = vmax.f32 %v615_v6, %v631_v7 }
  0xb6   :  { %v524_v11 = vpop.f32.mrf.mxu2  ;;  %v428_v15 = vpop.f32.mrf.mxu0 }
  0xb7   :  { %v808_v12 = vpop.f32.mrf.mxu3  ;;  %v844_v13 = vadd.f32 %v806_v10, %v647_v9  ;;  %v525_v14 = vadd.f32 %v524_v11, %v476_v8  ;;  %v477_v16 = vpop.f32.mrf.mxu1 }
  0xb8   :  { %v809_v20 = vadd.f32 %v1570_v55, %v808_v12  ;;  %v478_v22 = vadd.f32 %v477_v16, %v428_v15 }
  0xb9   :  { %v860_v17 = vmul.f32 0.70710677, %v844_v13  ;;  %v616_v18 = vadd.f32 %v1565_v51, %v525_v14 }
  0xbb   :  { %876 = vst [vmem:[#allocation3 + $0x8] sm:$0xff] %v860_v17  ;;  %v632_v19 = vmul.f32 0.2, %v616_v18 }
  0xbd   :  { %v648_v21 = vmax.f32 %v616_v18, %v632_v19 }
  0xbe   :  { %v526_v23 = vpop.f32.mrf.mxu2  ;;  %v431_v27 = vpop.f32.mrf.mxu0 }
  0xbf   :  { %v810_v24 = vpop.f32.mrf.mxu3  ;;  %v845_v25 = vadd.f32 %v809_v20, %v648_v21  ;;  %v527_v26 = vadd.f32 %v526_v23, %v478_v22  ;;  %v480_v28 = vpop.f32.mrf.mxu1 }
  0xc0   :  { %v481_v32 = vadd.f32 %v480_v28, %v431_v27  ;;  %v811_v34 = vadd.f32 %v1570_v55, %v810_v24 }
  0xc1   :  { %v861_v29 = vmul.f32 0.70710677, %v845_v25  ;;  %v617_v30 = vadd.f32 %v1565_v51, %v527_v26 }
  0xc3   :  { %877 = vst [vmem:[#allocation3 + $0x10] sm:$0xff] %v861_v29  ;;  %v633_v31 = vmul.f32 0.2, %v617_v30 }
  0xc5   :  { %v649_v33 = vmax.f32 %v617_v30, %v633_v31 }
  0xc6   :  { %v529_v35 = vpop.f32.mrf.mxu2  ;;  %v433_v39 = vpop.f32.mrf.mxu0 }
  0xc7   :  { %v813_v36 = vpop.f32.mrf.mxu3  ;;  %v846_v37 = vadd.f32 %v811_v34, %v649_v33  ;;  %v530_v38 = vadd.f32 %v529_v35, %v481_v32  ;;  %v482_v40 = vpop.f32.mrf.mxu1 }
  0xc8   :  { %v814_v44 = vadd.f32 %v1570_v55, %v813_v36  ;;  %v483_v46 = vadd.f32 %v482_v40, %v433_v39 }
  0xc9   :  { %v862_v41 = vmul.f32 0.70710677, %v846_v37  ;;  %v618_v42 = vadd.f32 %v1565_v51, %v530_v38 }
  0xcb   :  { %878 = vst [vmem:[#allocation3 + $0x18] sm:$0xff] %v862_v41  ;;  %v634_v43 = vmul.f32 0.2, %v618_v42 }
  0xcd   :  { %v650_v45 = vmax.f32 %v618_v42, %v634_v43 }
  0xce   :  { %v531_v47 = vpop.f32.mrf.mxu2  ;;  %v436_v52 = vpop.f32.mrf.mxu0 }
  0xcf   :  { %v815_v48 = vpop.f32.mrf.mxu3  ;;  %v847_v49 = vadd.f32 %v814_v44, %v650_v45  ;;  %v532_v50 = vadd.f32 %v531_v47, %v483_v46  ;;  %v485_v53 = vpop.f32.mrf.mxu1 }
  0xd0   :  { %v486_v58 = vadd.f32 %v485_v53, %v436_v52  ;;  %v816_v60 = vadd.f32 %v1570_v55, %v815_v48 }
  0xd1   :  { %v863_v54 = vmul.f32 0.70710677, %v847_v49  ;;  %v619_v56 = vadd.f32 %v1565_v51, %v532_v50 }
  0xd3   :  { %879 = vst [vmem:[#allocation3 + $0x20] sm:$0xff] %v863_v54  ;;  %v635_v57 = vmul.f32 0.2, %v619_v56 }
  0xd5   :  { %v651_v59 = vmax.f32 %v619_v56, %v635_v57 }
  0xd6   :  { %v534_v61 = vpop.f32.mrf.mxu2  ;;  %v438_v1 = vpop.f32.mrf.mxu0 }
  0xd7   :  { %v818_v62 = vpop.f32.mrf.mxu3  ;;  %v848_v63 = vadd.f32 %v816_v60, %v651_v59  ;;  %v535_v0 = vadd.f32 %v534_v61, %v486_v58  ;;  %v487_v2 = vpop.f32.mrf.mxu1 }
  0xd8   :  { %v819_v6 = vadd.f32 %v1570_v55, %v818_v62  ;;  %v488_v8 = vadd.f32 %v487_v2, %v438_v1 }
  0xd9   :  { %v864_v3 = vmul.f32 0.70710677, %v848_v63  ;;  %v620_v4 = vadd.f32 %v1565_v51, %v535_v0 }
  0xdb   :  { %880 = vst [vmem:[#allocation3 + $0x28] sm:$0xff] %v864_v3  ;;  %v636_v5 = vmul.f32 0.2, %v620_v4 }
  0xdd   :  { %v652_v7 = vmax.f32 %v620_v4, %v636_v5 }
  0xde   :  { %v536_v9 = vpop.f32.mrf.mxu2  ;;  %v441_v13 = vpop.f32.mrf.mxu0 }
  0xdf   :  { %v820_v10 = vpop.f32.mrf.mxu3  ;;  %v849_v11 = vadd.f32 %v819_v6, %v652_v7  ;;  %v537_v12 = vadd.f32 %v536_v9, %v488_v8  ;;  %v490_v14 = vpop.f32.mrf.mxu1 }
  0xe0   :  { %v491_v18 = vadd.f32 %v490_v14, %v441_v13  ;;  %v821_v20 = vadd.f32 %v1570_v55, %v820_v10 }
  0xe1   :  { %v865_v15 = vmul.f32 0.70710677, %v849_v11  ;;  %v621_v16 = vadd.f32 %v1565_v51, %v537_v12 }
  0xe3   :  { %881 = vst [vmem:[#allocation3 + $0x30] sm:$0xff] %v865_v15  ;;  %v637_v17 = vmul.f32 0.2, %v621_v16 }
  0xe5   :  { %v653_v19 = vmax.f32 %v621_v16, %v637_v17 }
  0xe6   :  { %v539_v21 = vpop.f32.mrf.mxu2  ;;  %v443_v25 = vpop.f32.mrf.mxu0 }
  0xe7   :  { %v823_v22 = vpop.f32.mrf.mxu3  ;;  %v850_v23 = vadd.f32 %v821_v20, %v653_v19  ;;  %v540_v24 = vadd.f32 %v539_v21, %v491_v18  ;;  %v492_v26 = vpop.f32.mrf.mxu1 }
  0xe8   :  { %v824_v30 = vadd.f32 %v1570_v55, %v823_v22  ;;  %v493_v32 = vadd.f32 %v492_v26, %v443_v25 }
  0xe9   :  { %v866_v27 = vmul.f32 0.70710677, %v850_v23  ;;  %v622_v28 = vadd.f32 %v1565_v51, %v540_v24 }
  0xeb   :  { %882 = vst [vmem:[#allocation3 + $0x38] sm:$0xff] %v866_v27  ;;  %v638_v29 = vmul.f32 0.2, %v622_v28 }
  0xed   :  { %v654_v31 = vmax.f32 %v622_v28, %v638_v29 }
  0xee   :  { %v541_v33 = vpop.f32.mrf.mxu2  ;;  %v446_v37 = vpop.f32.mrf.mxu0 }
  0xef   :  { %v825_v34 = vpop.f32.mrf.mxu3  ;;  %v851_v35 = vadd.f32 %v824_v30, %v654_v31  ;;  %v542_v36 = vadd.f32 %v541_v33, %v493_v32  ;;  %v495_v38 = vpop.f32.mrf.mxu1 }
  0xf0   :  { %v496_v42 = vadd.f32 %v495_v38, %v446_v37  ;;  %v826_v44 = vadd.f32 %v1570_v55, %v825_v34 }
  0xf1   :  { %v867_v39 = vmul.f32 0.70710677, %v851_v35  ;;  %v623_v40 = vadd.f32 %v1565_v51, %v542_v36 }
  0xf3   :  { %883 = vst [vmem:[#allocation3 + $0x40] sm:$0xff] %v867_v39  ;;  %v639_v41 = vmul.f32 0.2, %v623_v40 }
  0xf5   :  { %v655_v43 = vmax.f32 %v623_v40, %v639_v41 }
  0xf6   :  { %v544_v45 = vpop.f32.mrf.mxu2  ;;  %v448_v49 = vpop.f32.mrf.mxu0 }
  0xf7   :  { %v828_v46 = vpop.f32.mrf.mxu3  ;;  %v852_v47 = vadd.f32 %v826_v44, %v655_v43  ;;  %v545_v48 = vadd.f32 %v544_v45, %v496_v42  ;;  %v497_v50 = vpop.f32.mrf.mxu1 }
  0xf8   :  { %v829_v56 = vadd.f32 %v1570_v55, %v828_v46  ;;  %v498_v58 = vadd.f32 %v497_v50, %v448_v49 }
  0xf9   :  { %v868_v52 = vmul.f32 0.70710677, %v852_v47  ;;  %v624_v53 = vadd.f32 %v1565_v51, %v545_v48 }
  0xfb   :  { %884 = vst [vmem:[#allocation3 + $0x48] sm:$0xff] %v868_v52  ;;  %v640_v54 = vmul.f32 0.2, %v624_v53 }
  0xfd   :  { %v656_v57 = vmax.f32 %v624_v53, %v640_v54 }
  0xfe   :  { %v546_v59 = vpop.f32.mrf.mxu2  ;;  %v451_v63 = vpop.f32.mrf.mxu0 }
  0xff   :  { %v830_v60 = vpop.f32.mrf.mxu3  ;;  %v853_v61 = vadd.f32 %v829_v56, %v656_v57  ;;  %v547_v62 = vadd.f32 %v546_v59, %v498_v58  ;;  %v500_v0 = vpop.f32.mrf.mxu1 }
 0x100   :  { %v501_v4 = vadd.f32 %v500_v0, %v451_v63  ;;  %v831_v6 = vadd.f32 %v1570_v55, %v830_v60 }
 0x101   :  { %v869_v1 = vmul.f32 0.70710677, %v853_v61  ;;  %v625_v2 = vadd.f32 %v1565_v51, %v547_v62 }
 0x103   :  { %885 = vst [vmem:[#allocation3 + $0x50] sm:$0xff] %v869_v1  ;;  %v641_v3 = vmul.f32 0.2, %v625_v2 }
 0x105   :  { %v657_v5 = vmax.f32 %v625_v2, %v641_v3 }
 0x106   :  { %v549_v7 = vpop.f32.mrf.mxu2  ;;  %v453_v11 = vpop.f32.mrf.mxu0 }
 0x107   :  { %v833_v8 = vpop.f32.mrf.mxu3  ;;  %v854_v9 = vadd.f32 %v831_v6, %v657_v5  ;;  %v550_v10 = vadd.f32 %v549_v7, %v501_v4  ;;  %v502_v12 = vpop.f32.mrf.mxu1 }
 0x108   :  { %v834_v16 = vadd.f32 %v1570_v55, %v833_v8  ;;  %v503_v18 = vadd.f32 %v502_v12, %v453_v11 }
 0x109   :  { %v870_v13 = vmul.f32 0.70710677, %v854_v9  ;;  %v626_v14 = vadd.f32 %v1565_v51, %v550_v10 }
 0x10b   :  { %886 = vst [vmem:[#allocation3 + $0x58] sm:$0xff] %v870_v13  ;;  %v642_v15 = vmul.f32 0.2, %v626_v14 }
 0x10d   :  { %v658_v17 = vmax.f32 %v626_v14, %v642_v15 }
 0x10e   :  { %v551_v19 = vpop.f32.mrf.mxu2  ;;  %v456_v23 = vpop.f32.mrf.mxu0 }
 0x10f   :  { %v835_v20 = vpop.f32.mrf.mxu3  ;;  %v855_v21 = vadd.f32 %v834_v16, %v658_v17  ;;  %v552_v22 = vadd.f32 %v551_v19, %v503_v18  ;;  %v505_v24 = vpop.f32.mrf.mxu1 }
 0x110   :  { %v506_v28 = vadd.f32 %v505_v24, %v456_v23  ;;  %v836_v30 = vadd.f32 %v1570_v55, %v835_v20 }
 0x111   :  { %v871_v25 = vmul.f32 0.70710677, %v855_v21  ;;  %v627_v26 = vadd.f32 %v1565_v51, %v552_v22 }
 0x113   :  { %887 = vst [vmem:[#allocation3 + $0x60] sm:$0xff] %v871_v25  ;;  %v643_v27 = vmul.f32 0.2, %v627_v26 }
 0x115   :  { %v659_v29 = vmax.f32 %v627_v26, %v643_v27 }
 0x116   :  { %v554_v31 = vpop.f32.mrf.mxu2  ;;  %v458_v37 = vpop.f32.mrf.mxu0 }
 0x117   :  { %v856_v32 = vadd.f32 %v836_v30, %v659_v29  ;;  %v555_v33 = vadd.f32 %v554_v31, %v506_v28  ;;  %v838_v34 = vpop.f32.mrf.mxu3  ;;  %v507_v38 = vpop.f32.mrf.mxu1 }
 0x118   :  { %v839_v40 = vadd.f32 %v1570_v55, %v838_v34  ;;  %v508_v42 = vadd.f32 %v507_v38, %v458_v37 }
 0x119   :  { %v872_v35 = vmul.f32 0.70710677, %v856_v32  ;;  %v628_v36 = vadd.f32 %v1565_v51, %v555_v33 }
 0x11b   :  { %888 = vst [vmem:[#allocation3 + $0x68] sm:$0xff] %v872_v35  ;;  %v644_v39 = vmul.f32 0.2, %v628_v36 }
 0x11d   :  { %v660_v41 = vmax.f32 %v628_v36, %v644_v39 }
 0x11e   :  { %v556_v43 = vpop.f32.mrf.mxu2 }
 0x11f   :  { %v857_v44 = vadd.f32 %v839_v40, %v660_v41  ;;  %v557_v45 = vadd.f32 %v556_v43, %v508_v42  ;;  %v840_v48 = vpop.f32.mrf.mxu3 }
 0x120   :  { %v841_v52 = vadd.f32 %v1570_v55, %v840_v48 }
 0x121   :  { %v873_v46 = vmul.f32 0.70710677, %v857_v44  ;;  %v629_v47 = vadd.f32 %v1565_v51, %v557_v45 }
 0x123   :  { %889 = vst [vmem:[#allocation3 + $0x70] sm:$0xff] %v873_v46  ;;  %v645_v49 = vmul.f32 0.2, %v629_v47 }
 0x125   :  { %v661_v50 = vmax.f32 %v629_v47, %v645_v49 }
 0x127   :  { %v858_v53 = vadd.f32 %v841_v52, %v661_v50 }
 0x129   :  { %v874_v54 = vmul.f32 0.70710677, %v858_v53 }
 0x12b   :  { %890 = vst [vmem:[#allocation3 + $0x78] sm:$0xff] %v874_v54 }
 0x12c   :  { %903 = dma.vmem_to_hbm [thread:$0]  %s896_s3, 2048, %s898_s24, [#allocation4], %s1261_s25, %s1261_s25, %s1262_s4  }
 0x12d   :  { %1258 = dma.done.wait [#allocation4], 2048  }
 0x12e   :  { %1259 = vsyncadd [#allocation4], 4294965248 }
 0x12f   :  { %908 = vsyncpa [#allocation4], 1 }

</bundles_post_ra>
